<compile_context>
chip_gen: v7x
topology: tpu7x:2x2x1
jax: 0.10.0
libtpu: 0.0.40
codegen_flags: <defaults>
</compile_context>

<pallas_src>
import functools

import jax
import jax.numpy as jnp
from jax.experimental import pallas as pl
from jax.experimental.pallas import tpu as pltpu

NODE_TYPE_NUM = 3  # fixed in the module


def kv_attention_kernel(hidden_ref, mask_ref, emask_ref, wq_ref, o_ref, *,
                        leaky_alpha):
    """TB batch elements per grid step.

    hidden_ref : (TB, N, D) f32   VMEM
    mask_ref   : (TB, N, 1) i32   VMEM  (node type per node)
    emask_ref  : (TB, N, N) i8    VMEM  (union of training-edge types)
    wq_ref     : (NODE_TYPE_NUM+1, D, D) f32  VMEM (full, shared)
    o_ref      : (TB, N, D) f32   VMEM
    """
    tb, n, d = hidden_ref.shape

    # Flatten the batch*node axes so the projection matmuls have TB*N rows
    # (better MXU sublane fill than N rows per tiny matmul).
    h = hidden_ref[...].reshape(tb * n, d)           # (TB*N, D)
    mask = mask_ref[...].reshape(tb * n, 1)          # (TB*N, 1)

    # Per-node-type query projection.  Rows whose type != t are zeroed on the
    # input, so accumulation by add is exact and no post-matmul selects are
    # needed.  Type-0 rows stay exactly zero (matches torch.zeros init of
    # query_hidden in the reference).
    q = jnp.zeros((tb * n, d), jnp.float32)
    for t in range(1, NODE_TYPE_NUM + 1):            # static unrolled loop
        h_t = jnp.where(mask == t, h, 0.0)
        q = q + jnp.dot(h_t, wq_ref[t], preferred_element_type=jnp.float32)

    qb = q.reshape(tb, n, d)                         # (TB, N, D)

    # K == V == Q (the reference overwrites them with query_hidden).
    # scores[b, i, j] = sum_d q[b,i,d] * q[b,j,d]  -- contraction on the lane
    # dim of both operands, no explicit transpose.  Kept in f32 so the softmax
    # logits stay accurate.
    scores = jax.lax.dot_general(
        qb, qb,
        dimension_numbers=(((2,), (2,)), ((0,), (0,))),
        preferred_element_type=jnp.float32)          # (TB, N, N)

    # LeakyReLU(alpha)
    scores = jnp.where(scores > 0, scores, leaky_alpha * scores)

    # alpha = -9e15 everywhere except where adj hits a training edge type
    # (union mask precomputed in the wrapper; scores identical for every edge
    # type, so the union is exact).
    logits = jnp.where(emask_ref[...] != 0, scores, jnp.float32(-9e15))

    # Row softmax (max-subtracted, matches torch.softmax numerics); the
    # reciprocal goes to the otherwise-idle EUP slot.
    m = jnp.max(logits, axis=-1, keepdims=True)
    e = jnp.exp(logits - m)
    p = e * pl.reciprocal(jnp.sum(e, axis=-1, keepdims=True), approx=True)

    # Attention output: p @ q with bf16 MXU inputs, f32 accumulation.
    out = jax.lax.dot_general(
        p.astype(jnp.bfloat16), qb.astype(jnp.bfloat16),
        dimension_numbers=(((2,), (1,)), ((0,), (0,))),
        preferred_element_type=jnp.float32)          # (TB, N, D)

    o_ref[...] = out.astype(o_ref.dtype)
    # TODO(synk): with small D (<128 lanes) the output store is lane-masked;
    # a lane-dense (TB, N*D) output slab would help only for much larger N*D.


def _choose_block_b(batch, n, d, vmem_budget_bytes=8 * 1024 * 1024):
    """Largest TB dividing `batch` such that the double-buffered blocks fit a
    conservative VMEM budget and (when possible) >= 2 grid steps remain so the
    'parallel' axis can shard across v7x's 2 TensorCores."""
    def pad(x, m):
        return -(-x // m) * m

    def step_bytes(tb):
        hid = tb * pad(n, 8) * pad(d, 128) * 4        # hidden f32 block
        msk = tb * pad(n, 8) * 128 * 4                # (N,1) i32, lane-padded
        adj = tb * pad(n, 32) * pad(n, 128) * 1       # edge mask i8 block
        out = hid                                     # output f32 block
        wq = (NODE_TYPE_NUM + 1) * pad(d, 8) * pad(d, 128) * 4
        return 2 * (hid + msk + adj + out) + 2 * wq   # x2: double buffering

    best = 1
    for tb in range(1, batch + 1):
        if batch % tb:
            continue
        if batch >= 2 and batch // tb < 2:
            continue
        if step_bytes(tb) <= vmem_budget_bytes:
            best = tb
    return best


def kv_attention_layer(hidden, adj, node_type_mask, w_q, *,
                       edge_type_num, leaky_alpha, block_b=None):
    B, N, D = hidden.shape
    hidden = hidden.astype(jnp.float32)
    mask3 = node_type_mask.reshape(B, N, 1).astype(jnp.int32)

    # Union of training-edge types 1..edge_type_num, packed to int8: 4x less
    # HBM traffic / VMEM than int32 adj and no per-edge loop in the kernel.
    adj = adj.astype(jnp.int32)
    edge_mask = jnp.logical_and(adj >= 1, adj <= edge_type_num).astype(jnp.int8)

    tb = block_b if block_b is not None else _choose_block_b(B, N, D)
    assert B % tb == 0, "block_b must divide the batch size"

    kernel = functools.partial(kv_attention_kernel, leaky_alpha=leaky_alpha)

    return pl.pallas_call(
        kernel,
        out_shape=jax.ShapeDtypeStruct((B, N, D), jnp.float32),
        grid_spec=pltpu.PrefetchScalarGridSpec(
            num_scalar_prefetch=0,
            grid=(B // tb,),
            in_specs=[
                pl.BlockSpec((tb, N, D), lambda b: (b, 0, 0)),   # hidden
                pl.BlockSpec((tb, N, 1), lambda b: (b, 0, 0)),   # node type mask
                pl.BlockSpec((tb, N, N), lambda b: (b, 0, 0)),   # edge mask (i8)
                pl.BlockSpec((NODE_TYPE_NUM + 1, D, D),
                             lambda b: (0, 0, 0)),               # W_Q (shared)
            ],
            out_specs=pl.BlockSpec((tb, N, D), lambda b: (b, 0, 0)),
        ),
        compiler_params=pltpu.CompilerParams(
            dimension_semantics=("parallel",),
            vmem_limit_bytes=32 * 1024 * 1024,
        ),
    )(hidden, mask3, edge_mask, w_q)


def reference_forward(hidden, adj, node_type_mask, w_q, edge_type_num,
                      leaky_alpha):
    """Plain-JAX f32 transcription of the PyTorch forward (for verification)."""
    B, N, D = hidden.shape
    flat = hidden.reshape(-1, D)
    mask = node_type_mask.reshape(-1)
    q = jnp.zeros((B * N, D), jnp.float32)
    for n in range(1, NODE_TYPE_NUM + 1):
        qn = flat @ w_q[n]
        q = jnp.where((mask == n)[:, None], qn, q)
    q = q.reshape(B, N, D)
    scores = jnp.einsum("bnd,bmd->bnm", q, q)
    scores = jnp.where(scores > 0, scores, leaky_alpha * scores)
    alpha_mat = jnp.full((B, N, N), -9e15, jnp.float32)
    for r in range(1, edge_type_num + 1):
        alpha_mat = jnp.where(adj == r, scores, alpha_mat)
    p = jax.nn.softmax(alpha_mat, axis=-1)
    return jnp.einsum("bnm,bmd->bnd", p, q)


if __name__ == "__main__":
    B, N, D = 8, 8, 32          # small shapes; TB=4 -> grid=(2,)
    edge_type_num = 3
    leaky_alpha = 0.2

    key = jax.random.PRNGKey(0)
    k1, k2, k3, k4 = jax.random.split(key, 4)

    hidden = jax.random.normal(k1, (B, N, D), dtype=jnp.float32)
    adj = jax.random.randint(k2, (B, N, N), 0, edge_type_num + 1,
                             dtype=jnp.int32)
    node_type_mask = jax.random.randint(k3, (B, N), 0, NODE_TYPE_NUM + 1,
                                        dtype=jnp.int32)

    # Deterministic xavier-uniform-style init for W_Q (shape from __init__).
    limit = (6.0 / (D + D)) ** 0.5
    w_q = jax.random.uniform(k4, (NODE_TYPE_NUM + 1, D, D),
                             dtype=jnp.float32, minval=-limit, maxval=limit)

    out = kv_attention_layer(hidden, adj, node_type_mask, w_q,
                             edge_type_num=edge_type_num,
                             leaky_alpha=leaky_alpha)
    out = jax.block_until_ready(out)

    ref = reference_forward(hidden, adj, node_type_mask, w_q,
                            edge_type_num, leaky_alpha)
    assert out.shape == (B, N, D)
    # Tolerance accounts for the bf16 MXU inputs on the p @ q matmul and the
    # approximate EUP reciprocal in the softmax (f32 reference above).
    assert jnp.allclose(out, ref, atol=2e-2, rtol=2e-2), "mismatch vs reference"

    print("KERNEL_OK")
</pallas_src>

<mosaic_0001>
module attributes {stable_mosaic.version = 11 : i64} {
  func.func @kv_attention_kernel(%arg0: i32, %arg1: memref<4x8x32xf32, #tpu.memory_space<vmem>>, %arg2: memref<4x8x1xi32, #tpu.memory_space<vmem>>, %arg3: memref<4x8x8xi8, #tpu.memory_space<vmem>>, %arg4: memref<4x32x32xf32, #tpu.memory_space<vmem>>, %arg5: memref<4x8x32xf32, #tpu.memory_space<vmem>>) attributes {dimension_semantics = [#tpu.dimension_semantics<parallel>], iteration_bounds = array<i64: 2>, scalar_prefetch = 0 : i64, scratch_operands = 0 : i64, tpu.core_type = #tpu.core_type<tc>, window_params = [{transform_indices = @transform_0, window_bounds = array<i64: 4, 8, 32>}, {transform_indices = @transform_1, window_bounds = array<i64: 4, 8, 1>}, {transform_indices = @transform_2, window_bounds = array<i64: 4, 8, 8>}, {pipeline_mode = #tpu.pipeline_mode<synchronous>, transform_indices = @transform_3, window_bounds = array<i64: 4, 32, 32>}, {transform_indices = @transform_4, window_bounds = array<i64: 4, 8, 32>}]} {
    %c0 = arith.constant 0 : index
    %c0_0 = arith.constant 0 : index
    %c0_1 = arith.constant 0 : index
    %0 = vector.load %arg1[%c0, %c0_0, %c0_1] : memref<4x8x32xf32, #tpu.memory_space<vmem>>, vector<4x8x32xf32>
    %1 = vector.shape_cast %0 : vector<4x8x32xf32> to vector<32x32xf32>
    %c0_2 = arith.constant 0 : index
    %c0_3 = arith.constant 0 : index
    %c0_4 = arith.constant 0 : index
    %2 = vector.load %arg2[%c0_2, %c0_3, %c0_4] : memref<4x8x1xi32, #tpu.memory_space<vmem>>, vector<4x8x1xi32>
    %3 = vector.shape_cast %2 : vector<4x8x1xi32> to vector<32x1xi32>
    %cst = arith.constant 0.000000e+00 : f32
    %4 = vector.broadcast %cst : f32 to vector<32x32xf32>
    %c1_i32 = arith.constant 1 : i32
    %5 = vector.broadcast %c1_i32 : i32 to vector<32x1xi32>
    %6 = arith.cmpi eq, %3, %5 : vector<32x1xi32>
    %cst_5 = arith.constant 0.000000e+00 : f32
    %7 = vector.shape_cast %6 : vector<32x1xi1> to vector<32x1xi1>
    %8 = vector.broadcast %7 : vector<32x1xi1> to vector<32x32xi1>
    %9 = vector.broadcast %cst_5 : f32 to vector<32x32xf32>
    %10 = arith.select %8, %1, %9 : vector<32x32xi1>, vector<32x32xf32>
    %c1 = arith.constant 1 : index
    %c0_6 = arith.constant 0 : index
    %c0_7 = arith.constant 0 : index
    %11 = vector.load %arg4[%c1, %c0_6, %c0_7] : memref<4x32x32xf32, #tpu.memory_space<vmem>>, vector<1x32x32xf32>
    %12 = vector.shape_cast %11 : vector<1x32x32xf32> to vector<32x32xf32>
    %cst_8 = arith.constant dense<0.000000e+00> : vector<32x32xf32>
    %13 = tpu.matmul %10, %12, %cst_8 {dimension_numbers = #tpu.dot_dimension_numbers<[1], [0], [0], [1], [0, 0, 1, 1], [], []>} : vector<32x32xf32>, vector<32x32xf32>, vector<32x32xf32> -> vector<32x32xf32>
    %14 = arith.addf %4, %13 : vector<32x32xf32>
    %c2_i32 = arith.constant 2 : i32
    %15 = vector.broadcast %c2_i32 : i32 to vector<32x1xi32>
    %16 = arith.cmpi eq, %3, %15 : vector<32x1xi32>
    %cst_9 = arith.constant 0.000000e+00 : f32
    %17 = vector.shape_cast %16 : vector<32x1xi1> to vector<32x1xi1>
    %18 = vector.broadcast %17 : vector<32x1xi1> to vector<32x32xi1>
    %19 = vector.broadcast %cst_9 : f32 to vector<32x32xf32>
    %20 = arith.select %18, %1, %19 : vector<32x32xi1>, vector<32x32xf32>
    %c2 = arith.constant 2 : index
    %c0_10 = arith.constant 0 : index
    %c0_11 = arith.constant 0 : index
    %21 = vector.load %arg4[%c2, %c0_10, %c0_11] : memref<4x32x32xf32, #tpu.memory_space<vmem>>, vector<1x32x32xf32>
    %22 = vector.shape_cast %21 : vector<1x32x32xf32> to vector<32x32xf32>
    %cst_12 = arith.constant dense<0.000000e+00> : vector<32x32xf32>
    %23 = tpu.matmul %20, %22, %cst_12 {dimension_numbers = #tpu.dot_dimension_numbers<[1], [0], [0], [1], [0, 0, 1, 1], [], []>} : vector<32x32xf32>, vector<32x32xf32>, vector<32x32xf32> -> vector<32x32xf32>
    %24 = arith.addf %14, %23 : vector<32x32xf32>
    %c3_i32 = arith.constant 3 : i32
    %25 = vector.broadcast %c3_i32 : i32 to vector<32x1xi32>
    %26 = arith.cmpi eq, %3, %25 : vector<32x1xi32>
    %cst_13 = arith.constant 0.000000e+00 : f32
    %27 = vector.shape_cast %26 : vector<32x1xi1> to vector<32x1xi1>
    %28 = vector.broadcast %27 : vector<32x1xi1> to vector<32x32xi1>
    %29 = vector.broadcast %cst_13 : f32 to vector<32x32xf32>
    %30 = arith.select %28, %1, %29 : vector<32x32xi1>, vector<32x32xf32>
    %c3 = arith.constant 3 : index
    %c0_14 = arith.constant 0 : index
    %c0_15 = arith.constant 0 : index
    %31 = vector.load %arg4[%c3, %c0_14, %c0_15] : memref<4x32x32xf32, #tpu.memory_space<vmem>>, vector<1x32x32xf32>
    %32 = vector.shape_cast %31 : vector<1x32x32xf32> to vector<32x32xf32>
    %cst_16 = arith.constant dense<0.000000e+00> : vector<32x32xf32>
    %33 = tpu.matmul %30, %32, %cst_16 {dimension_numbers = #tpu.dot_dimension_numbers<[1], [0], [0], [1], [0, 0, 1, 1], [], []>} : vector<32x32xf32>, vector<32x32xf32>, vector<32x32xf32> -> vector<32x32xf32>
    %34 = arith.addf %24, %33 : vector<32x32xf32>
    %35 = vector.shape_cast %34 : vector<32x32xf32> to vector<4x8x32xf32>
    %cst_17 = arith.constant dense<0.000000e+00> : vector<4x8x8xf32>
    %36 = tpu.matmul %35, %35, %cst_17 {dimension_numbers = #tpu.dot_dimension_numbers<[2], [2], [1], [1], [0, 0, 0, 1, 1, 1], [0], [0]>} : vector<4x8x32xf32>, vector<4x8x32xf32>, vector<4x8x8xf32> -> vector<4x8x8xf32>
    %cst_18 = arith.constant 0.000000e+00 : f32
    %37 = vector.broadcast %cst_18 : f32 to vector<4x8x8xf32>
    %38 = arith.cmpf ogt, %36, %37 : vector<4x8x8xf32>
    %cst_19 = arith.constant 2.000000e-01 : f32
    %39 = vector.broadcast %cst_19 : f32 to vector<4x8x8xf32>
    %40 = arith.mulf %39, %36 : vector<4x8x8xf32>
    %41 = arith.select %38, %36, %40 : vector<4x8x8xi1>, vector<4x8x8xf32>
    %c0_20 = arith.constant 0 : index
    %c0_21 = arith.constant 0 : index
    %c0_22 = arith.constant 0 : index
    %42 = vector.load %arg3[%c0_20, %c0_21, %c0_22] : memref<4x8x8xi8, #tpu.memory_space<vmem>>, vector<4x8x8xi8>
    %c0_i8 = arith.constant 0 : i8
    %43 = vector.broadcast %c0_i8 : i8 to vector<4x8x8xi8>
    %44 = arith.cmpi ne, %42, %43 : vector<4x8x8xi8>
    %cst_23 = arith.constant -9.000000e+15 : f32
    %45 = vector.broadcast %cst_23 : f32 to vector<4x8x8xf32>
    %46 = arith.select %44, %41, %45 : vector<4x8x8xi1>, vector<4x8x8xf32>
    %cst_24 = arith.constant dense<0xFF800000> : vector<4x8xf32>
    %47 = vector.multi_reduction <maximumf>, %46, %cst_24 [2] : vector<4x8x8xf32> to vector<4x8xf32>
    %48 = vector.shape_cast %47 : vector<4x8xf32> to vector<4x8x1xf32>
    %49 = vector.broadcast %48 : vector<4x8x1xf32> to vector<4x8x8xf32>
    %50 = arith.subf %46, %49 : vector<4x8x8xf32>
    %51 = math.exp %50 : vector<4x8x8xf32>
    %cst_25 = arith.constant dense<0.000000e+00> : vector<4x8xf32>
    %52 = vector.multi_reduction <add>, %51, %cst_25 [2] : vector<4x8x8xf32> to vector<4x8xf32>
    %53 = vector.shape_cast %52 : vector<4x8xf32> to vector<4x8x1xf32>
    %54 = tpu.reciprocal %53 {approx = true} : vector<4x8x1xf32> -> vector<4x8x1xf32>
    %55 = vector.broadcast %54 : vector<4x8x1xf32> to vector<4x8x8xf32>
    %56 = arith.mulf %51, %55 : vector<4x8x8xf32>
    %57 = arith.truncf %56 : vector<4x8x8xf32> to vector<4x8x8xbf16>
    %58 = arith.truncf %35 : vector<4x8x32xf32> to vector<4x8x32xbf16>
    %cst_26 = arith.constant dense<0.000000e+00> : vector<4x8x32xf32>
    %59 = tpu.matmul %57, %58, %cst_26 {dimension_numbers = #tpu.dot_dimension_numbers<[2], [1], [1], [2], [0, 0, 0, 1, 1, 2], [0], [0]>} : vector<4x8x8xbf16>, vector<4x8x32xbf16>, vector<4x8x32xf32> -> vector<4x8x32xf32>
    %c0_27 = arith.constant 0 : index
    %c0_28 = arith.constant 0 : index
    %c0_29 = arith.constant 0 : index
    %60 = vector.load %arg5[%c0_27, %c0_28, %c0_29] : memref<4x8x32xf32, #tpu.memory_space<vmem>>, vector<4x8x32xf32>
    tpu.vector_store %arg5[%c0_27, %c0_28, %c0_29], %59 {strides = array<i32>} : memref<4x8x32xf32, #tpu.memory_space<vmem>>, vector<4x8x32xf32>,
    return
  }
  func.func @transform_0(%arg0: i32) -> (i32, i32, i32) {
    %c0_i32 = arith.constant 0 : i32
    %c0_i32_0 = arith.constant 0 : i32
    %c0_i32_1 = arith.constant 0 : i32
    return %arg0, %c0_i32, %c0_i32_0 : i32, i32, i32
  }
  func.func @transform_1(%arg0: i32) -> (i32, i32, i32) {
    %c0_i32 = arith.constant 0 : i32
    %c0_i32_0 = arith.constant 0 : i32
    %c0_i32_1 = arith.constant 0 : i32
    return %arg0, %c0_i32, %c0_i32_0 : i32, i32, i32
  }
  func.func @transform_2(%arg0: i32) -> (i32, i32, i32) {
    %c0_i32 = arith.constant 0 : i32
    %c0_i32_0 = arith.constant 0 : i32
    %c0_i32_1 = arith.constant 0 : i32
    return %arg0, %c0_i32, %c0_i32_0 : i32, i32, i32
  }
  func.func @transform_3(%arg0: i32) -> (i32, i32, i32) {
    %c0_i32 = arith.constant 0 : i32
    %c0_i32_0 = arith.constant 0 : i32
    %c0_i32_1 = arith.constant 0 : i32
    %c0_i32_2 = arith.constant 0 : i32
    return %c0_i32, %c0_i32_0, %c0_i32_1 : i32, i32, i32
  }
  func.func @transform_4(%arg0: i32) -> (i32, i32, i32) {
    %c0_i32 = arith.constant 0 : i32
    %c0_i32_0 = arith.constant 0 : i32
    %c0_i32_1 = arith.constant 0 : i32
    return %arg0, %c0_i32, %c0_i32_0 : i32, i32, i32
  }
}

</mosaic_0001>

<bundles_post_ra>
// kernel: tpu_custom_call.1
= control target key start
LH: loop header
LB: loop body
LE: loop exit
PB: predicated region body
PF: predicated region fallthrough
CT: control target
= control target key end

     0   :  { %9 = vsyncpa [#allocation3], 0  ;;  %s2139_s0 = inlined_call_operand.vmem [shape: f32[8,8,32], index: 0, kind: input, shape index: {}]   ;;  %s2140_s1 = inlined_call_operand.vmem [shape: s32[8,8,1], index: 1, kind: input, shape index: {}]   ;;  %s2141_s2 = inlined_call_operand.hbm [shape: s8[8,8,8], index: 2, kind: input, shape index: {}]   ;;  %s2142_s3 = inlined_call_operand.hbm [shape: f32[4,32,32], index: 3, kind: input, shape index: {}]   ;;  %s2143_s4 = inlined_call_operand.hbm [shape: f32[8,8,32], index: 4, kind: output, shape index: {}]  }
   0x1   :  { %11 = vsyncpa [#allocation3 + $0x1], 0 }
   0x2   :  { %12 = vsyncpa [#allocation6], 0 }
   0x3   :  { %13 = vsyncpa [#allocation4], 0 }
   0x4   :  { %15 = vsyncpa [#allocation4 + $0x1], 0  ;;  %s1829_s15 = smov 0   ;;  %s1831_s16 = smov 0  }
   0x5   :  { %s1833_s17 = smov 0   ;;  %s1835_s18 = smov 0  }
   0x6 LB: > { %s1850_s19 = sadd.s32 4294967295, %s1790_s18   ;;  %s1374_s20 = sadd.s32 4294967294, %s1790_s18   ;;  %s1790_s18 = sphi %s1835_s18, %s2163_s18   ;;  %s1786_s17 = sphi %s1833_s17, %s2162_s17   ;;  %s1782_s16 = sphi %s1831_s16, %s2161_s16   ;;  %s1778_s15 = sphi %s1829_s15, %s2160_s15  }
   0x7   : > { %p93_p0 = scmp.ne.s32.totalorder %s1782_s16, %s1778_s15  ;;  %p2144_p1 = scmp.eq.s32.totalorder %s1850_s19, 0 }
   0x8   : > { %p144_p3 = scmp.eq.s32.totalorder %s1374_s20, 1  ;;  %p1375_p5 = scmp.ge.s32.totalorder %s1790_s18, 1 }
   0x9   : > { %p1859_p4 = por %p2144_p1, %p93_p0  ;;  %p151_p7 = scmp.lt.s32.totalorder %s1790_s18, 3 }
   0xa   : > { %p1864_p6 = por %p144_p3, %p93_p0  ;;  %s1792_s24 = smov [#allocation5]  }
   0xb   : > { %s2147_s21 = scalar_select %p1859_p4, 1, 0 }
   0xc   : > { %s2148_s22 = scalar_select %p1864_p6, 1, 0 }
   0xd   : > { %p1869_p8 = pnand %p1375_p5, %p151_p7  ;;  %s163_s25 = sshll.u32 %s1792_s24, 4  ;;  %s1873_s25 = int_to_ptr.vmem [resolvable:$true] %s163_s25 }
   0xe   : > { %s1885_s27 = sadd.s32 1, %s1790_s18   ;;  %s80_s28 = sadd.s32 1, %s1786_s17 }
   0xf   : > { %s2149_s23 = scalar_select %p1869_p8, 1, 0 }
  0x10   : > { %p1586_p9 = pneg %p1869_p8  ;;  %s77_s29 = ssub.s32 %s1790_s18, %s1885_s27 }
  0x11   : > { %s1662_s6 = scalar_lea.hbm %s2142_s3, 2048 }
  0x12   : > { %p1880_p11 = pnand %p1586_p9, %p2144_p1  ;;  %p1663_p12 = scmp.ne.s32.totalorder %s2142_s3, %s1662_s6 }
  0x13   : > { %p1669_p5 = scmp.lt.u32.totalorder %s1662_s6, %s2142_s3 }
  0x14   : > { %p1664_p13 = pneg %p1880_p11 }
  0x16   : > { %p1665_p0 = pnand %p1664_p13, %p1663_p12 }
  0x18   : > { %p1666_p3 = pneg %p1665_p0 }
  0x1a   : > { %p1671_p7 = pnand %p1669_p5, %p1666_p3 }
  0x1c   : > { %1674 = shalt.err (!%p1671_p7)
}
  0x1d   : > { %s1675_s11 = scalar_lea.vmem %s1873_s25, 2048  ;;  %p1683_p2 = scmp.lt.s32.totalorder %s1873_s25, %s1873_s25 }
  0x1e   : > { %p1676_p9 = scmp.ne.s32.totalorder %s1873_s25, %s1675_s11  ;;  %p1684_p6 = scmp.lt.s32.totalorder %s1675_s11, %s1675_s11 }
  0x20   : > { %p1678_p10 = pnand %p1676_p9, %p1664_p13  ;;  %p1685_p4 = por %p1684_p6, %p1683_p2 }
  0x22   : > { %p1679_p1 = pneg %p1678_p10 }
  0x24   : > { %p1686_p8 = pnand %p1685_p4, %p1679_p1 }
  0x26   : > { %1689 = shalt.err (!%p1686_p8)
}
  0x27   : > { %s1793_s12 = smov 128   ;;  %s1794_s13 = smov 8  }
  0x28   : > { %1589 = dma.hbm_to_vmem [thread:$0]  (!%p1880_p11), %s2142_s3, 2048, %s1873_s25, [#allocation6], %s1793_s12, %s1793_s12, %s1794_s13  }
  0x29   : > { %p78_p2 = scmp.eq.s32.totalorder %s77_s29, 0  ;;  %p87_p1 = scmp.ne.s32.totalorder %s1786_s17, %s1782_s16 }
  0x2a   : > { %p88_p4 = scmp.eq.s32.totalorder %s1790_s18, 0  ;;  %p1599_p6 = scmp.lt.s32.totalorder %s1790_s18, 2 }
  0x2b   : > { %s1916_s24 = scalar_select %p78_p2, %s1786_s17, %s80_s28  }
  0x2c   : > { %p89_p8 = por %p88_p4, %p87_p1  ;;  %p2151_p10 = scmp.eq.s32.totalorder %s1850_s19, 1 }
  0x2d   : > { %s195_s5 = sand.u32 1, %s1786_s17   ;;  %s1418_s6 = sshll.u32 %s1790_s18, 7 }
  0x2e   : > { %p1920_p12 = por %p2151_p10, %p87_p1  ;;  %s1378_s7 = sshll.u32 %s195_s5, 3 }
  0x2f   : > { %s1929_s9 = scalar_lea.hbm %s2141_s2, %s1418_s6  ;;  %s199_s25 = scalar_lea.vmem [#allocation2], %s1378_s7 }
  0x30   : > { %s206_s28 = sshll.u32 %s199_s25, 4  ;;  %p1931_p11 = pnand %p1599_p6, %p89_p8  ;;  %s1935_s28 = int_to_ptr.vmem [resolvable:$true] %s206_s28 }
  0x31   : > { %s1937_s10 = scalar_lea.sflag [#allocation3], %s195_s5  ;;  %s1690_s11 = scalar_lea.hbm %s1929_s9, 128 }
  0x32   : > { %p1691_p13 = scmp.ne.s32.totalorder %s1929_s9, %s1690_s11  ;;  %p1692_p0 = pneg %p1931_p11 }
  0x33   : > { %s1695_s14 = scalar_lea.hbm %s2141_s2, 256  ;;  %p1696_p7 = scmp.lt.u32.totalorder %s1929_s9, %s2141_s2 }
  0x34   : > { %p1693_p3 = pnand %p1692_p0, %p1691_p13  ;;  %p1697_p9 = scmp.lt.u32.totalorder %s1695_s14, %s1690_s11 }
  0x35   : > { %p1699_p1 = scmp.lt.u32.totalorder %s1690_s11, %s1929_s9 }
  0x36   : > { %p1694_p5 = pneg %p1693_p3  ;;  %p1698_p2 = por %p1697_p9, %p1696_p7 }
  0x38   : > { %p1700_p4 = por %p1699_p1, %p1698_p2 }
  0x3a   : > { %p1701_p6 = pnand %p1700_p4, %p1694_p5 }
  0x3c   : > { %1704 = shalt.err (!%p1701_p6)
}
  0x3d   : > { %s1705_s5 = scalar_lea.vmem %s1935_s28, 128  ;;  %s1795_s7 = smov [#allocation2]  }
  0x3e   : > { %p1706_p8 = scmp.ne.s32.totalorder %s1935_s28, %s1705_s5  ;;  %s1710_s26 = sshll.u32 %s1795_s7, 4  ;;  %s1711_s26 = int_to_ptr.vmem [resolvable:$false] %s1710_s26 }
  0x3f   : > { %s1712_s8 = scalar_lea.vmem %s1711_s26, 256  ;;  %p1713_p3 = scmp.lt.s32.totalorder %s1935_s28, %s1711_s26 }
  0x40   : > { %p1708_p10 = pnand %p1706_p8, %p1692_p0  ;;  %p1714_p7 = scmp.lt.s32.totalorder %s1712_s8, %s1705_s5 }
  0x42   : > { %p1709_p13 = pneg %p1708_p10  ;;  %p1715_p9 = por %p1714_p7, %p1713_p3 }
  0x44   : > { %p1716_p2 = pnand %p1715_p9, %p1709_p13 }
  0x46   : > { %1719 = shalt.err (!%p1716_p2)
}
  0x47   : > { %s1796_s25 = smov 32   ;;  %s1797_s11 = smov 2  }
  0x48   : > { %1593 = dma.hbm_to_vmem [thread:$0]  (!%p1931_p11), %s1929_s9, 128, %s1935_s28, %s1937_s10, %s1796_s25, %s1796_s25, %s1797_s11  }
  0x49   : > { %p2154_p0 = scmp.ne.s32.totalorder %s2149_s23, 0 }
  0x4a   : > { %s1968_s12 = sand.u32 (!%p2154_p0), 1, %s1782_s16   ;;  %p2155_p5 = scmp.ne.s32.totalorder (!%p2154_p0), %s2147_s21, 0 }
  0x4b   : > { %218 = sbr.rel (%p2154_p0) target bundleno = 1237 (0x4d5), region = 36  ;;  %s1382_s13 = sshll.u32 (!%p2154_p0), %s1968_s12, 3 }
  0x4c   : > { %s221_s14 = scalar_lea.sflag (!%p2154_p0), [#allocation3], %s1968_s12  ;;  %s1972_s20 = scalar_lea.vmem (!%p2154_p0), [#allocation2], %s1382_s13 }
  0x52   : > { %1765 = dma.done.wait (%p2155_p5), %s221_s14, 128  }
  0x53   : > { %1767 = vsyncadd (%p2155_p5), %s221_s14, 4294967168  ;;  %p2156_p11 = scmp.eq.s32.totalorder %s1850_s19, 0 }
  0x55   : > { %1769 = dma.done.wait (%p2156_p11), [#allocation6], 2048   ;;  %p2157_p1 = pmov %p2156_p11 }
  0x56   : > { %s1385_s23 = sshll.u32 %s1850_s19, 2  ;;  %v1798_v0 = vmov 0   ;;  %v350_v7 = vld [vmem:[#allocation5 + $0x40] sm:$0xff]  ;;  %v351_v8 = vld [vmem:[#allocation5 + $0x48] sm:$0xff]  ;;  %v352_v11 = vld [vmem:[#allocation5 + $0x50] sm:$0xff]  ;;  %vm354_vm12 = vcmask 261120  }
  0x57   : > { %1771 = vsyncadd (%p2157_p1), [#allocation6], 4294965248  ;;  %1645 = vset.pattern.permute.xlu1 %v1798_v0  ;;  %1644 = vset.pattern.permute.xlu0 %v1798_v0  ;;  %p264_p4 = scmp.lt.s32.totalorder %s1385_s23, 7  ;;  %v353_v12 = vld [vmem:[#allocation5 + $0x58] sm:$0xff]  ;;  %v1546_v13 = vpack.c.bf16 %v351_v8, %v350_v7  ;;  %v317_v15 = vld [vmem:[#allocation5 + $0x20] sm:$0xff]  ;;  %v1799_v63 = vmov 0.0  }
  0x58   : > { %v1550_v14 = vpack.c.bf16 %v353_v12, %v352_v11  ;;  %v318_v16 = vld [vmem:[#allocation5 + $0x28] sm:$0xff]  ;;  %v319_v31 = vld [vmem:[#allocation5 + $0x30] sm:$0xff]  ;;  %v320_v32 = vld [vmem:[#allocation5 + $0x38] sm:$0xff]  ;;  %1502 = vmatprep.subr.mxu1 %v1799_v63  ;;  %s1384_s7 = sshll.u32 %s1968_s12, 5  ;;  %s1419_s25 = sshll.u32 %s1850_s19, 9 }
  0x59   : > { %s2165_s23 = smov (!%p264_p4, %s1385_s23), 7  ;;  %1547 = vmatprep.subr.bf16.mxu0 %v1546_v13  ;;  %v1554_v19 = vpack.c.bf16 %v318_v16, %v317_v15  ;;  %v1558_v37 = vpack.c.bf16 %v320_v32, %v319_v31  ;;  %v578_v39 = vld [vmem:[#allocation5 + $0x60] sm:$0xff]  ;;  %v579_v40 = vld [vmem:[#allocation5 + $0x68] sm:$0xff]  ;;  %v580_v47 = vld [vmem:[#allocation5 + $0x70] sm:$0xff]  ;;  %s262_s26 = scalar_lea.vmem [#allocation7], %s1384_s7 }
  0x5a   : > { %s1386_s21 = sshll.u32 %s2165_s23, 3  ;;  %1549 = vmatpush3.bf16.msra.mxu0 %v1546_v13  ;;  %v1562_v44 = vpack.c.bf16 %v579_v40, %v578_v39  ;;  %v581_v48 = vld [vmem:[#allocation5 + $0x78] sm:$0xff]  ;;  %s1267_s8 = sshll.u32 %s262_s26, 4  ;;  %s2089_s8 = int_to_ptr.vmem [resolvable:$true] %s1267_s8 }
  0x5b   : > { %s273_s29 = scalar_lea.vmem %s2140_s1, %s1386_s21  ;;  %1551 = vmatprep.subr.bf16.mxu0 %v1550_v14  ;;  %s267_s5 = scalar_lea.vmem %s2139_s0, %s1386_s21  ;;  %v1566_v51 = vpack.c.bf16 %v581_v48, %v580_v47  ;;  %v987_v13 = vld [vmem:[%s1972_s20] sm:$0x3]  ;;  %v989_v16 = vld [vmem:[%s1972_s20 + $0x4] sm:$0x3] }
  0x5c   : > { %v286_v1 = vld [vmem:[%s273_s29 + $0x10] sm:$0xff]  ;;  %v284_v2 = vld [vmem:[%s273_s29] sm:$0xff]  ;;  %v287_v3 = vld [vmem:[%s273_s29 + $0x18] sm:$0xff]  ;;  %s2094_s14 = scalar_lea.hbm %s2143_s4, %s1419_s25  ;;  %s1720_s23 = scalar_lea.vmem %s2089_s8, 512 }
  0x5d   : > { %vm323_vm0 = vcmp.eq.s32.totalorder %v286_v1, 2  ;;  %vm321_vm1 = vcmp.eq.s32.totalorder %v284_v2, 2  ;;  %vm324_vm2 = vcmp.eq.s32.totalorder %v287_v3, 2  ;;  %v285_v4 = vld [vmem:[%s273_s29 + $0x8] sm:$0xff]  ;;  %vm288_vm5 = vcmp.eq.s32.totalorder %v284_v2, 1  ;;  %v280_v26 = vld [vmem:[%s267_s5] sm:$0xff]  ;;  %p1721_p6 = scmp.ne.s32.totalorder %s2089_s8, %s1720_s23 }
  0x5e   : > { %v327_v5 = vsel %vm323_vm0, 1, %v1798_v0  ;;  %v325_v6 = vsel %vm321_vm1, 1, %v1798_v0  ;;  %vm322_vm3 = vcmp.eq.s32.totalorder %v285_v4, 2  ;;  %v328_v9 = vsel %vm324_vm2, 1, %v1798_v0  ;;  %1553 = vmatpush3.bf16.msra.mxu0 %v1550_v14  ;;  %v282_v29 = vld [vmem:[%s267_s5 + $0x10] sm:$0xff]  ;;  %v281_v33 = vld [vmem:[%s267_s5 + $0x8] sm:$0xff] }
  0x5f   : > { %336 = vperm.xlu1 %1645, %v327_v5   ;;  %330 = vperm.xlu0 %1644, %v325_v6   ;;  %v326_v10 = vsel %vm322_vm3, 1, %v1798_v0  ;;  %vm289_vm4 = vcmp.eq.s32.totalorder %v285_v4, 1  ;;  %v292_v18 = vsel %vm288_vm5, 1, %v1798_v0  ;;  %vm291_vm6 = vcmp.eq.s32.totalorder %v287_v3, 1  ;;  %v283_v41 = vld [vmem:[%s267_s5 + $0x18] sm:$0xff]  ;;  %p1722_p8 = pnand %p1721_p6, %p1920_p12  ;;  %s1801_s19 = smov [#allocation7]  }
  0x60   : > { %v293_v17 = vsel %vm289_vm4, 1, %v1798_v0  ;;  %vm290_vm7 = vcmp.eq.s32.totalorder %v286_v1, 1  ;;  %v295_v20 = vsel %vm291_vm6, 1, %v1798_v0  ;;  %vm550_vm8 = vcmp.eq.s32.totalorder %v285_v4, 3  ;;  %1555 = vmatprep.subr.bf16.mxu0 %v1554_v19  ;;  %v988_v14 = vld [vmem:[%s1972_s20 + $0x2] sm:$0x3] }
  0x61   : > { %v294_v21 = vsel %vm290_vm7, 1, %v1798_v0  ;;  %vm549_vm9 = vcmp.eq.s32.totalorder %v284_v2, 3  ;;  %v554_v22 = vsel %vm550_vm8, 1, %v1798_v0  ;;  %vm552_vm10 = vcmp.eq.s32.totalorder %v287_v3, 3  ;;  %p1723_p10 = pneg %p1722_p8  ;;  %s1724_s21 = sshll.u32 %s1801_s19, 4  ;;  %s1725_s21 = int_to_ptr.vmem [resolvable:$false] %s1724_s21 }
  0x62   : > { %v553_v23 = vsel %vm549_vm9, 1, %v1798_v0  ;;  %vm551_vm11 = vcmp.eq.s32.totalorder %v286_v1, 3  ;;  %v556_v24 = vsel %vm552_vm10, 1, %v1798_v0  ;;  %vm1800_vm9 = vmmov 0   ;;  %s1726_s9 = scalar_lea.vmem %s1725_s21, 1024  ;;  %p1727_p13 = scmp.lt.s32.totalorder %s2089_s8, %s1725_s21 }
  0x63   : > { %339 = vperm.xlu1 %1645, %v328_v9   ;;  %333 = vperm.xlu0 %1644, %v326_v10   ;;  %v555_v25 = vsel %vm551_vm11, 1, %v1798_v0  ;;  %vm1067_vm10 = vcmask 1043456   ;;  %vm991_vm11 = vnez %v987_v13  ;;  %p1728_p3 = scmp.lt.s32.totalorder %s1726_s9, %s1720_s23 }
  0x64   : > { %1504 = vmatprep.mubr.msk.f32.mxu1 %vm1800_vm9, %v1799_v63  ;;  %v995_v15 = vsel %vm991_vm11, 16843009, %v1798_v0 }
  0x65   : > { %p1729_p7 = por %p1728_p3, %p1727_p13 }
  0x67   : > { %300 = vperm.xlu1 %1645, %v293_v17   ;;  %297 = vperm.xlu0 %1644, %v292_v18   ;;  %v999_v17 = vunpack.c.0.s8 %v995_v15  ;;  %p1730_p9 = pnand %p1729_p7, %p1723_p10 }
  0x6b   : > { %306 = vperm.xlu1 %1645, %v295_v20   ;;  %303 = vperm.xlu0 %1644, %v294_v21   ;;  %v990_v20 = vld [vmem:[%s1972_s20 + $0x6] sm:$0x3]  ;;  %s1254_s20 = scalar_lea.sflag [#allocation4], %s1968_s12 }
  0x6f   : > { %561 = vperm.xlu1 %1645, %v554_v22   ;;  %558 = vperm.xlu0 %1644, %v553_v23  }
  0x73   : > { %567 = vperm.xlu1 %1645, %v556_v24   ;;  %564 = vperm.xlu0 %1644, %v555_v25  }
  0xde   : > { %v337_v27 = vpop.permute.xlu1 %336  ;;  %v331_v28 = vpop.permute.xlu0 %330 }
  0xdf   : > { %vm341_vm13 = vcmp.eq.s32.totalorder %v331_v28, 1  ;;  %vm343_vm14 = vcmp.eq.s32.totalorder %v337_v27, 1 }
  0xe0   : > { %v345_v30 = vsel %vm341_vm13, %v280_v26, 0.0  ;;  %v347_v36 = vsel %vm343_vm14, %v282_v29, 0.0  ;;  %vm992_vm13 = vnez %v988_v14  ;;  %vm993_vm14 = vnez %v989_v16 }
  0xe1   : > { %1468 = vmatprep.mubr.msk.f32.mxu0 %vm354_vm12, %v345_v30  ;;  %v996_v18 = vsel %vm992_vm13, 16843009, %v1798_v0  ;;  %v997_v24 = vsel %vm993_vm14, 16843009, %v1798_v0 }
  0xe2   : > { %v340_v34 = vpop.permute.xlu1 %339  ;;  %v334_v35 = vpop.permute.xlu0 %333  ;;  %v1000_v23 = vunpack.c.0.s8 %v996_v18  ;;  %v1001_v28 = vunpack.c.0.s8 %v997_v24 }
  0xe3   : > { %vm342_vm15 = vcmp.eq.s32.totalorder %v334_v35, 1  ;;  %vm344_vm0 = vcmp.eq.s32.totalorder %v340_v34, 1 }
  0xe4   : > { %v346_v38 = vsel %vm342_vm15, %v281_v33, 0.0  ;;  %v348_v45 = vsel %vm344_vm0, %v283_v41, 0.0  ;;  %vm1003_vm15 = vcmp.ne.s32.totalorder %v999_v17, 0 }
  0xe5   : > { %1469 = vmatmul.mubr.msk.f32.vlgmr.msra.gmra.mrb[0].mxu0 %vm354_vm12, %v346_v38 }
  0xe6   : > { %1557 = vmatpush3.bf16.msra.mxu0 %v1554_v19  ;;  %v301_v42 = vpop.permute.xlu1 %300  ;;  %v298_v43 = vpop.permute.xlu0 %297  ;;  %1471 = vmatprep.mubr.msk.f32.mxu0 %vm354_vm12, %v347_v36 }
  0xe7   : > { %vm308_vm1 = vcmp.eq.s32.totalorder %v298_v43, 1  ;;  %1559 = vmatprep.subr.bf16.mxu0 %v1558_v37  ;;  %vm309_vm2 = vcmp.eq.s32.totalorder %v301_v42, 1 }
  0xe8   : > { %v312_v46 = vsel %vm308_vm1, %v280_v26, 0.0  ;;  %v313_v52 = vsel %vm309_vm2, %v281_v33, 0.0  ;;  %vm1011_vm1 = vcmask 64512   ;;  %vm994_vm2 = vnez %v990_v20 }
  0xe9   : > { %1472 = vmatmul.mubr.msk.f32.gmra.mrb[2].mxu0 %vm354_vm12, %v348_v45  ;;  %v998_v32 = vsel %vm994_vm2, 16843009, %v1798_v0 }
  0xea   : > { %1561 = vmatpush3.bf16.msra.mxu0 %v1558_v37  ;;  %v307_v49 = vpop.permute.xlu1 %306  ;;  %v304_v50 = vpop.permute.xlu0 %303  ;;  %1482 = vmatprep.mubr.msk.f32.mxu0 %vm354_vm12, %v312_v46  ;;  %v1002_v39 = vunpack.c.0.s8 %v998_v32 }
  0xeb   : > { %vm310_vm3 = vcmp.eq.s32.totalorder %v304_v50, 1  ;;  %1563 = vmatprep.subr.bf16.mxu0 %v1562_v44  ;;  %vm311_vm4 = vcmp.eq.s32.totalorder %v307_v49, 1 }
  0xec   : > { %v314_v53 = vsel %vm310_vm3, %v282_v29, 0.0  ;;  %v315_v56 = vsel %vm311_vm4, %v283_v41, 0.0  ;;  %vm1004_vm4 = vcmp.ne.s32.totalorder %v1000_v23, 0 }
  0xed   : > { %1483 = vmatmul.mubr.msk.f32.vlgmr.msra.gmra.mrb[0].mxu0 %vm354_vm12, %v313_v52 }
  0xee   : > { %1565 = vmatpush3.bf16.msra.mxu0 %v1562_v44  ;;  %v562_v54 = vpop.permute.xlu1 %561  ;;  %v559_v55 = vpop.permute.xlu0 %558  ;;  %1485 = vmatprep.mubr.msk.f32.mxu0 %vm354_vm12, %v314_v53 }
  0xef   : > { %vm569_vm5 = vcmp.eq.s32.totalorder %v559_v55, 1  ;;  %1567 = vmatprep.subr.bf16.mxu0 %v1566_v51  ;;  %vm570_vm6 = vcmp.eq.s32.totalorder %v562_v54, 1 }
  0xf0   : > { %v573_v57 = vsel %vm569_vm5, %v280_v26, 0.0  ;;  %v574_v60 = vsel %vm570_vm6, %v281_v33, 0.0  ;;  %vm1005_vm5 = vcmp.ne.s32.totalorder %v1001_v28, 0 }
  0xf1   : > { %1486 = vmatmul.mubr.msk.f32.gmra.mrb[2].mxu0 %vm354_vm12, %v315_v56 }
  0xf2   : > { %1569 = vmatpush3.bf16.msra.mxu0 %v1566_v51  ;;  %v568_v58 = vpop.permute.xlu1 %567  ;;  %v565_v59 = vpop.permute.xlu0 %564  ;;  %1496 = vmatprep.mubr.msk.f32.mxu0 %vm354_vm12, %v573_v57 }
  0xf3   : > { %vm571_vm7 = vcmp.eq.s32.totalorder %v565_v59, 1  ;;  %vm572_vm8 = vcmp.eq.s32.totalorder %v568_v58, 1  ;;  %1534 = vmatprep.subr.bf16.mxu0 %v1799_v63 }
  0xf4   : > { %v575_v61 = vsel %vm571_vm7, %v282_v29, 0.0  ;;  %v576_v62 = vsel %vm572_vm8, %v283_v41, 0.0  ;;  %vm1006_vm8 = vcmp.ne.s32.totalorder %v1002_v39, 0 }
  0xf5   : > { %1497 = vmatmul.mubr.msk.f32.vlgmr.msra.gmra.mrb[0].mxu0 %vm354_vm12, %v574_v60 }
  0xf6   : > { %1499 = vmatprep.mubr.msk.f32.mxu0 %vm354_vm12, %v575_v61 }
  0xf9   : > { %1500 = vmatmul.mubr.msk.f32.gmra.mrb[2].mxu0 %vm354_vm12, %v576_v62 }
  0xfa   : > { %1536 = vmatprep.mubr.msk.bf16.mxu0 %vm1800_vm9, %v1799_v63 }
 0x1c8   : > { %v1498_v1 = vpop.f32.mrb[0].mxu0 }
 0x1c9   : > { %v1061_v2 = vpack.c.bf16 %v1498_v1, %v1498_v1  ;;  %v660_v3 = vpop.f32.mrb[1].mxu0 }
 0x1ca   : > { %1503 = vmatpush3.xpose.msk.msra.mxu1 %vm354_vm12, %v660_v3  ;;  %v1060_v11 = vpack.c.bf16 %v660_v3, %v660_v3 }
 0x1cb   : > { %1507 = vmatprep.subr.mxu1 %v1799_v63  ;;  %v2031_v4 = vsel %vm1067_vm10, %v1061_v2, 0 }
 0x1cc   : > { %v1501_v5 = vpop.f32.mrb[2].mxu0  ;;  %v1069_v12 = vsel %vm1067_vm10, %v1060_v11, 0 }
 0x1cd   : > { %v1063_v6 = vpack.c.bf16 %v1501_v5, %v1501_v5  ;;  %v670_v7 = vpop.f32.mrb[3].mxu0  ;;  %1505 = vmatmul.mubr.msk.f32.vlgmr.msra.gmra.mrb[0].mxu1 %vm354_vm12, %v660_v3 }
 0x1ce   : > { %v1062_v8 = vpack.c.bf16 %v670_v7, %v670_v7  ;;  %1508 = vmatpush3.xpose.msk.msra.mxu1 %vm354_vm12, %v1498_v1  ;;  %1509 = vmatprep.mubr.msk.f32.mxu1 %vm1800_vm9, %v1799_v63 }
 0x1cf   : > { %1512 = vmatprep.subr.mxu1 %v1799_v63  ;;  %v2039_v9 = vsel %vm1067_vm10, %v1063_v6, 0 }
 0x1d0   : > { %v1161_v10 = vsel %vm1067_vm10, %v1062_v8, 0 }
 0x1d1   : > { %1510 = vmatmul.mubr.msk.f32.vlgmr.msra.gmra.mrb[2].mxu1 %vm354_vm12, %v1498_v1  ;;  %1535 = vmatpush3.bf16.msra.mxu0 %v1161_v10 }
 0x1d2   : > { %1513 = vmatpush3.xpose.msk.msra.mxu1 %vm354_vm12, %v670_v7  ;;  %1514 = vmatprep.mubr.msk.f32.mxu1 %vm1800_vm9, %v1799_v63 }
 0x1d3   : > { %1517 = vmatprep.subr.mxu1 %v1799_v63 }
 0x1d5   : > { %1515 = vmatmul.mubr.msk.f32.vlgmr.msra.gmra.mrb[4].mxu1 %vm354_vm12, %v670_v7 }
 0x1d6   : > { %1518 = vmatpush3.xpose.msk.msra.mxu1 %vm354_vm12, %v1501_v5  ;;  %1519 = vmatprep.mubr.msk.f32.mxu1 %vm1800_vm9, %v1799_v63 }
 0x1d7   : > { %1522 = vmatprep.subr.bf16.mxu1 %v1799_v63 }
 0x1d9   : > { %1520 = vmatmul.mubr.msk.f32.vlgmr.msra.gmra.mrb[6].mxu1 %vm354_vm12, %v1501_v5 }
 0x1da   : > { %1523 = vmatpush3.bf16.msra.mxu1 %v1069_v12  ;;  %1524 = vmatprep.mubr.msk.bf16.mxu1 %vm1800_vm9, %v1799_v63 }
 0x1db   : > { %1528 = vmatprep.subr.bf16.mxu1 %v1799_v63 }
 0x2a0   : > { %v752_v19 = vpop.f32.mrb[0].mxu1 }
 0x2a1   : > { %vm975_vm0 = vcmp.gt.f32.partialorder %v752_v19, 0.0  ;;  %v979_v21 = vmul.f32 0.2, %v752_v19  ;;  %v1506_v22 = vpop.f32.mrb[1].mxu1 }
 0x2a3   : > { %v983_v25 = vsel %vm975_vm0, %v752_v19, %v979_v21 }
 0x2a4   : > { %v825_v26 = vpop.f32.mrb[2].mxu1  ;;  %v1007_v27 = vsel %vm1003_vm15, %v983_v25, -9e+15 }
 0x2a5   : > { %vm976_vm3 = vcmp.gt.f32.partialorder %v825_v26, 0.0  ;;  %v980_v29 = vmul.f32 0.2, %v825_v26  ;;  %v1511_v30 = vpop.f32.mrb[3].mxu1  ;;  %v1012_v31 = vsel %vm1011_vm1, %v1007_v27, -inf }
 0x2a6   : > { %1013 = vmax.xlane.f32.xlu0 %v1012_v31 }
 0x2a7   : > { %v984_v33 = vsel %vm976_vm3, %v825_v26, %v980_v29 }
 0x2a8   : > { %v898_v34 = vpop.f32.mrb[4].mxu1  ;;  %v1008_v35 = vsel %vm1004_vm4, %v984_v33, -9e+15 }
 0x2a9   : > { %vm977_vm6 = vcmp.gt.f32.partialorder %v898_v34, 0.0  ;;  %v981_v36 = vmul.f32 0.2, %v898_v34  ;;  %v1516_v37 = vpop.f32.mrb[5].mxu1  ;;  %v1015_v38 = vsel %vm1011_vm1, %v1008_v35, -inf }
 0x2aa   : > { %1016 = vmax.xlane.f32.xlu1 %v1015_v38 }
 0x2ab   : > { %v985_v40 = vsel %vm977_vm6, %v898_v34, %v981_v36 }
 0x2ac   : > { %v971_v41 = vpop.f32.mrb[6].mxu1  ;;  %v1009_v42 = vsel %vm1005_vm5, %v985_v40, -9e+15 }
 0x2ad   : > { %vm978_vm7 = vcmp.gt.f32.partialorder %v971_v41, 0.0  ;;  %v982_v43 = vmul.f32 0.2, %v971_v41  ;;  %v1521_v44 = vpop.f32.mrb[7].mxu1  ;;  %v1018_v45 = vsel %vm1011_vm1, %v1009_v42, -inf }
 0x2ae   : > { %1019 = vmax.xlane.f32.xlu0 %v1018_v45 }
 0x2af   : > { %v986_v0 = vsel %vm978_vm7, %v971_v41, %v982_v43 }
 0x2b0   : > { %v1010_v46 = vsel %vm1006_vm8, %v986_v0, -9e+15 }
 0x2b1   : > { %v1021_v47 = vsel %vm1011_vm1, %v1010_v46, -inf }
 0x2b2   : > { %1022 = vmax.xlane.f32.xlu0 %v1021_v47 }
 0x333   : > { %v1014_v48 = vpop.xlane.xlu0 %1013 }
 0x334   : > { %v1024_v49 = vsub.f32 %v1007_v27, %v1014_v48 }
 0x336   : > { %v1028_v50 = vmul.f32 1.442695, %v1024_v49 }
 0x337   : > { %v1017_v51 = vpop.xlane.xlu1 %1016 }
 0x338   : > { %1646 = vpow2.f32 %v1028_v50  ;;  %v1025_v52 = vsub.f32 %v1008_v35, %v1017_v51 }
 0x33a   : > { %v1030_v53 = vmul.f32 1.442695, %v1025_v52 }
 0x33b   : > { %v1020_v54 = vpop.xlane.xlu0 %1019 }
 0x33c   : > { %1648 = vpow2.f32 %v1030_v53  ;;  %v1026_v55 = vsub.f32 %v1009_v42, %v1020_v54 }
 0x33e   : > { %v1032_v56 = vmul.f32 1.442695, %v1026_v55 }
 0x33f   : > { %v1023_v57 = vpop.xlane.xlu0 %1022 }
 0x340   : > { %1650 = vpow2.f32 %v1032_v56  ;;  %v1027_v58 = vsub.f32 %v1010_v46, %v1023_v57 }
 0x342   : > { %v1647_v59 = vpop.eup %1646  ;;  %v1034_v60 = vmul.f32 1.442695, %v1027_v58 }
 0x343   : > { %v1036_v61 = vsel %vm1011_vm1, %v1647_v59, 0.0 }
 0x344   : > { %1652 = vpow2.f32 %v1034_v60  ;;  %1037 = vadd.xlane.f32.xlu1 %v1036_v61 }
 0x346   : > { %v1649_v62 = vpop.eup %1648 }
 0x347   : > { %v1039_v1 = vsel %vm1011_vm1, %v1649_v62, 0.0 }
 0x348   : > { %1040 = vadd.xlane.f32.xlu0 %v1039_v1 }
 0x34a   : > { %v1651_v2 = vpop.eup %1650 }
 0x34b   : > { %v1042_v3 = vsel %vm1011_vm1, %v1651_v2, 0.0 }
 0x34c   : > { %1043 = vadd.xlane.f32.xlu1 %v1042_v3 }
 0x34e   : > { %v1653_v5 = vpop.eup %1652 }
 0x34f   : > { %v1045_v6 = vsel %vm1011_vm1, %v1653_v5, 0.0 }
 0x350   : > { %1046 = vadd.xlane.f32.xlu0 %v1045_v6 }
 0x3d1   : > { %v1038_v7 = vpop.xlane.xlu1 %1037 }
 0x3d2   : > { %1654 = vrcp.f32 %v1038_v7 }
 0x3d5   : > { %v1041_v8 = vpop.xlane.xlu0 %1040 }
 0x3d6   : > { %1656 = vrcp.f32 %v1041_v8 }
 0x3d9   : > { %v1044_v10 = vpop.xlane.xlu1 %1043 }
 0x3da   : > { %1658 = vrcp.f32 %v1044_v10 }
 0x3dc   : > { %v1655_v11 = vpop.eup %1654 }
 0x3dd   : > { %v1052_v12 = vmul.f32 %v1655_v11, %v1647_v59  ;;  %v1047_v13 = vpop.xlane.xlu0 %1046 }
 0x3de   : > { %1660 = vrcp.f32 %v1047_v13 }
 0x3df   : > { %v1056_v14 = vpack.c.bf16 %v1052_v12, %v1052_v12 }
 0x3e0   : > { %v1657_v15 = vpop.eup %1656 }
 0x3e1   : > { %1525 = vmatmul.mubr.msk.bf16.vlgmr.msra.gmra.mrb[8].mxu1 %vm1011_vm1, %v1056_v14  ;;  %v1053_v16 = vmul.f32 %v1657_v15, %v1649_v62 }
 0x3e2   : > { %1529 = vmatpush3.bf16.msra.mxu1 %v2031_v4  ;;  %1530 = vmatprep.mubr.msk.bf16.mxu1 %vm1800_vm9, %v1799_v63 }
 0x3e3   : > { %1540 = vmatprep.subr.bf16.mxu1 %v1799_v63  ;;  %v1057_v20 = vpack.c.bf16 %v1053_v16, %v1053_v16 }
 0x3e4   : > { %v1659_v17 = vpop.eup %1658 }
 0x3e5   : > { %v1054_v18 = vmul.f32 %v1659_v17, %v1651_v2 }
 0x3e7   : > { %v1058_v19 = vpack.c.bf16 %v1054_v18, %v1054_v18 }
 0x3e8   : > { %v1661_v21 = vpop.eup %1660 }
 0x3e9   : > { %1531 = vmatmul.mubr.msk.bf16.vlgmr.msra.gmra.mrb[12].mxu1 %vm1011_vm1, %v1057_v20  ;;  %1537 = vmatmul.mubr.msk.bf16.vlgmr.msra.gmra.mrb[4].mxu0 %vm1011_vm1, %v1058_v19  ;;  %v1055_v4 = vmul.f32 %v1661_v21, %v1653_v5 }
 0x3ea   : > { %1541 = vmatpush3.bf16.msra.mxu1 %v2039_v9  ;;  %1542 = vmatprep.mubr.msk.bf16.mxu1 %vm1800_vm9, %v1799_v63 }
 0x3eb   : > { %v1059_v22 = vpack.c.bf16 %v1055_v4, %v1055_v4 }
 0x3f1   : > { %1543 = vmatmul.mubr.msk.bf16.vlgmr.msra.gmra.mrb[16].mxu1 %vm1011_vm1, %v1059_v22 }
 0x4b4   : > { %v1105_v23 = vpop.f32.mrb[8].mxu1 }
 0x4b5   : > { %1249 = vst.msk [vmem:[%s262_s26] sm:$0xff] %vm354_vm12, %v1105_v23  ;;  %v1526_v24 = vpop.f32.mrb[9].mxu1 }
 0x4b6   : > { %v1108_v25 = vpop.f32.mrb[10].mxu1 }
 0x4b7   : > { %v1527_v26 = vpop.f32.mrb[11].mxu1 }
 0x4bc   : > { %v1151_v27 = vpop.f32.mrb[12].mxu1  ;;  %v1197_v28 = vpop.f32.mrb[4].mxu0 }
 0x4bd   : > { %1250 = vst.msk [vmem:[%s262_s26 + $0x8] sm:$0xff] %vm354_vm12, %v1151_v27  ;;  %1251 = vst.msk [vmem:[%s262_s26 + $0x10] sm:$0xff] %vm354_vm12, %v1197_v28  ;;  %v1532_v63 = vpop.f32.mrb[13].mxu1  ;;  %v1538_v9 = vpop.f32.mrb[5].mxu0 }
 0x4be   : > { %v1154_v29 = vpop.f32.mrb[14].mxu1  ;;  %v1200_v30 = vpop.f32.mrb[6].mxu0 }
 0x4bf   : > { %v1533_v31 = vpop.f32.mrb[15].mxu1  ;;  %v1539_v32 = vpop.f32.mrb[7].mxu0 }
 0x4c4   : > { %v1243_v33 = vpop.f32.mrb[16].mxu1 }
 0x4c5   : > { %1252 = vst.msk [vmem:[%s262_s26 + $0x18] sm:$0xff] %vm354_vm12, %v1243_v33  ;;  %v1544_v34 = vpop.f32.mrb[17].mxu1 }
 0x4c6   : > { %v1246_v35 = vpop.f32.mrb[18].mxu1 }
 0x4c7   : > { %1733 = shalt.err (!%p1730_p9)
}
 0x4c8   : > { %s1734_s28 = scalar_lea.hbm %s2094_s14, 512  ;;  %s1738_s6 = scalar_lea.hbm %s2143_s4, 1024 }
 0x4c9   : > { %p1735_p2 = scmp.ne.s32.totalorder %s2094_s14, %s1734_s28  ;;  %p1739_p11 = scmp.lt.u32.totalorder %s2094_s14, %s2143_s4 }
 0x4ca   : > { %p1740_p1 = scmp.lt.u32.totalorder %s1738_s6, %s1734_s28  ;;  %p1742_p6 = scmp.lt.u32.totalorder %s1734_s28, %s2094_s14 }
 0x4cb   : > { %p1736_p0 = pnand %p1735_p2, %p1920_p12 }
 0x4cc   : > { %p1741_p4 = por %p1740_p1, %p1739_p11 }
 0x4cd   : > { %p1737_p5 = pneg %p1736_p0 }
 0x4ce   : > { %p1743_p8 = por %p1742_p6, %p1741_p4 }
 0x4d0   : > { %p1744_p10 = pnand %p1743_p8, %p1737_p5 }
 0x4d2   : > { %1747 = shalt.err (!%p1744_p10)
}
 0x4d3   : > { %s1802_s26 = smov 128   ;;  %s1803_s25 = smov 8   ;;  %v1545_v36 = vpop.f32.mrb[19].mxu1 }
 0x4d4   : > { %1584 = dma.vmem_to_hbm [thread:$0]  (%p1920_p12), %s2089_s8, 512, %s2094_s14, %s1254_s20, %s1802_s26, %s1802_s26, %s1803_s25  }
 0x4d5 PF: > { %s1282_s11 = sand.u32 1, %s1778_s15   ;;  %p2158_p13 = scmp.ne.s32.totalorder %s2148_s22, 0 }
 0x4d6   : > { %p2159_p3 = scmp.ge.s32.totalorder %s1790_s18, 2  ;;  %s1283_s13 = scalar_lea.sflag [#allocation4], %s1282_s11 }
 0x4d8   : > { %p1595_p7 = pnand %p2159_p3, %p2158_p13 }
 0x4da   : > { %1773 = dma.done.wait (!%p1595_p7), %s1283_s13, 512  }
 0x4db   : > { %1775 = vsyncadd (!%p1595_p7), %s1283_s13, 4294966784  ;;  %p18_p9 = scmp.ge.s32.totalorder %s1885_s27, 4   ;;  %s2160_s15 = smov %s1782_s16 }
 0x4dc   : > { %s2161_s16 = smov %s1786_s17  ;;  %s2162_s17 = smov %s1916_s24 }
 0x4dd   : > { %s2163_s18 = smov %s1885_s27  ;;  %20 = sbr.rel (!%p18_p9) target bundleno = 6 (0x6), region = 94 }
 0x4e4   :  { %1288 = vsyncpa [#allocation3], 1 }
 0x4e5   :  { %1290 = vsyncpa [#allocation3 + $0x1], 1 }
 0x4e6   :  { %1291 = vsyncpa [#allocation6], 1 }
 0x4e7   :  { %1292 = vsyncpa [#allocation4], 1 }
 0x4e8   :  { %1294 = vsyncpa [#allocation4 + $0x1], 1 }

</bundles_post_ra>
